<compile_context>
chip_gen: v7x
topology: tpu7x:2x2x1
jax: 0.10.0
libtpu: 0.0.40
codegen_flags: <defaults>
</compile_context>

<pallas_src>
import jax
import jax.numpy as jnp
from jax.experimental import pallas as pl
from jax.experimental.pallas import tpu as pltpu


def _round_up(v, m):
    return (v + m - 1) // m * m


# ---------------------------------------------------------------------------
# Fused GCNConv + PReLU kernel
#   xw_k   = X[k]  @ W                      (f32 matmul, cast to bf16)
#   out[i]+= A_hat[i, k] @ xw_k             (bf16 inputs, f32 accumulation in o_ref)
#   out[i] = prelu(out[i] + b)              (in place, only at the last k)
# ---------------------------------------------------------------------------
def gcn_fused_kernel(a_ref, x_ref, w_ref, b_ref, alpha_ref, o_ref):
    k = pl.program_id(1)

    @pl.when(k == 0)
    def _():
        o_ref[...] = jnp.zeros_like(o_ref)

    # Skinny feature transform for this reduction tile (recompute is free:
    # this kernel is HBM-bound, the MXU has plenty of slack).
    xw = jnp.dot(
        x_ref[...], w_ref[...], preferred_element_type=jnp.float32
    ).astype(jnp.bfloat16)

    # Accumulate directly into the resident output block (f32).
    o_ref[...] += jnp.dot(a_ref[...], xw, preferred_element_type=jnp.float32)

    @pl.when(k == pl.num_programs(1) - 1)
    def _():
        h = o_ref[...] + b_ref[...]
        o_ref[...] = jnp.where(h > 0, h, alpha_ref[...] * h)


def sug_encoder_forward(x, edge_index, w, b, alpha, *, tm=512, tk=1024):
    """x: [N, Cin] f32, edge_index: [2, E] int32 (row 0 = src, row 1 = dst)."""
    n, cin = x.shape
    hidden = w.shape[1]

    # Clamp tiles for small graphs (keep tm a multiple of 8 sublanes and tk a
    # multiple of 128 lanes), then pad row / reduction axes independently.
    tm_eff = min(tm, _round_up(n, 8))
    tk_eff = min(tk, _round_up(n, 128))
    rows_p = _round_up(n, tm_eff)
    red_p = _round_up(n, tk_eff)
    h_p = _round_up(hidden, 128)      # lane-dense output stores
    c_p = _round_up(cin, 8)           # sublane-aligned input features

    # ---- glue (plain JAX): dense normalized adjacency with self-loops ------
    # TODO(synk): for realistic graphs replace the dense O(N^2) adjacency with a
    # block-sparse / edge-list formulation (PrefetchScalarGridSpec with per-row-
    # tile neighbor offsets in SMEM + manual make_async_copy gathers of XW rows);
    # dense A_hat is the real ceiling once N is non-trivial.
    src, dst = edge_index[0], edge_index[1]
    adj = jnp.zeros((n, n), jnp.float32)
    adj = adj.at[dst, src].set(1.0)                    # A[i, j] = 1 for edge j -> i
    diag = jnp.arange(n)
    adj = adj.at[diag, diag].set(1.0)                  # self loops
    deg = adj.sum(axis=1)
    dinv = jnp.where(deg > 0, jax.lax.rsqrt(deg), 0.0)
    a_hat = dinv[:, None] * adj * dinv[None, :]
    a_hat_p = (
        jnp.zeros((rows_p, red_p), jnp.bfloat16)
        .at[:n, :n].set(a_hat.astype(jnp.bfloat16))
    )

    # Padded features / parameters (X stays f32: tiny stream, exact X@W).
    x_p = jnp.zeros((red_p, c_p), jnp.float32).at[:n, :cin].set(x)
    w_p = jnp.zeros((c_p, h_p), jnp.float32).at[:cin, :hidden].set(w)
    b_p = jnp.zeros((1, h_p), jnp.float32).at[0, :hidden].set(b)
    alpha_p = jnp.zeros((1, h_p), jnp.float32).at[0, :hidden].set(alpha)

    # ---- fused Pallas kernel: A_hat @ (X @ W) + bias + PReLU ----------------
    # Per-step VMEM at defaults (h_p=128): A 1 MiB x2 buffers, X 32 KiB x2,
    # W 4 KiB, out 256 KiB x2 -> ~2.6 MiB; under every generation's scoped
    # default.  Raise tk (and vmem_limit_bytes) further on v7x for big N.
    out = pl.pallas_call(
        gcn_fused_kernel,
        out_shape=jax.ShapeDtypeStruct((rows_p, h_p), jnp.float32),
        grid=(rows_p // tm_eff, red_p // tk_eff),
        in_specs=[
            pl.BlockSpec((tm_eff, tk_eff), lambda i, k: (i, k)),   # A_hat tile (bf16)
            pl.BlockSpec((tk_eff, c_p), lambda i, k: (k, 0)),      # X tile (f32)
            pl.BlockSpec((c_p, h_p), lambda i, k: (0, 0)),         # W (resident)
            pl.BlockSpec((1, h_p), lambda i, k: (0, 0)),           # bias
            pl.BlockSpec((1, h_p), lambda i, k: (0, 0)),           # PReLU slope
        ],
        out_specs=pl.BlockSpec((tm_eff, h_p), lambda i, k: (i, 0)),
        compiler_params=pltpu.CompilerParams(
            dimension_semantics=("parallel", "arbitrary")),
    )(a_hat_p, x_p, w_p, b_p, alpha_p)

    return out[:n, :hidden]


if __name__ == "__main__":
    key = jax.random.PRNGKey(0)
    k_x, k_w = jax.random.split(key, 2)

    N = 8             # number of nodes
    IN_CHANNELS = 4
    HIDDEN = 32

    # deterministic synthetic inputs / parameters
    x = jax.random.normal(k_x, (N, IN_CHANNELS), jnp.float32)

    # simple deterministic undirected ring graph (both directions)
    src = jnp.arange(N, dtype=jnp.int32)
    dst = (src + 1) % N
    edge_index = jnp.concatenate(
        [jnp.stack([src, dst]), jnp.stack([dst, src])], axis=1)  # [2, 2N]

    # GCNConv params: glorot-like weight, zero bias; PReLU default slope 0.25
    w = jax.random.normal(k_w, (IN_CHANNELS, HIDDEN), jnp.float32) * (
        1.0 / jnp.sqrt(jnp.float32(IN_CHANNELS)))
    b = jnp.zeros((HIDDEN,), jnp.float32)
    alpha = jnp.full((HIDDEN,), 0.25, jnp.float32)

    out = sug_encoder_forward(x, edge_index, w, b, alpha)
    jax.block_until_ready(out)

    # lightweight sanity check against a pure-JAX reference (same bf16 casts
    # as the kernel path, f32 accumulation)
    adj = jnp.zeros((N, N), jnp.float32).at[edge_index[1], edge_index[0]].set(1.0)
    adj = adj.at[jnp.arange(N), jnp.arange(N)].set(1.0)
    deg = adj.sum(axis=1)
    dinv = jax.lax.rsqrt(deg)
    a_hat_ref = dinv[:, None] * adj * dinv[None, :]
    a_bf = a_hat_ref.astype(jnp.bfloat16).astype(jnp.float32)
    xw_bf = (x @ w).astype(jnp.bfloat16).astype(jnp.float32)
    ref = a_bf @ xw_bf + b[None, :]
    ref = jnp.where(ref > 0, ref, alpha[None, :] * ref)
    assert jnp.allclose(out, ref, atol=2e-2, rtol=2e-2), "mismatch vs reference"

    print("KERNEL_OK")
</pallas_src>

<mosaic_0001>
module attributes {stable_mosaic.version = 11 : i64} {
  func.func @gcn_fused_kernel(%arg0: i32, %arg1: i32, %arg2: memref<8x128xbf16, #tpu.memory_space<vmem>>, %arg3: memref<128x8xf32, #tpu.memory_space<vmem>>, %arg4: memref<8x128xf32, #tpu.memory_space<vmem>>, %arg5: memref<1x128xf32, #tpu.memory_space<vmem>>, %arg6: memref<1x128xf32, #tpu.memory_space<vmem>>, %arg7: memref<8x128xf32, #tpu.memory_space<vmem>>) attributes {dimension_semantics = [#tpu.dimension_semantics<parallel>, #tpu.dimension_semantics<arbitrary>], iteration_bounds = array<i64: 1, 1>, scalar_prefetch = 0 : i64, scratch_operands = 0 : i64, tpu.core_type = #tpu.core_type<tc>, window_params = [{transform_indices = @transform_0, window_bounds = array<i64: 8, 128>}, {transform_indices = @transform_1, window_bounds = array<i64: 128, 8>}, {pipeline_mode = #tpu.pipeline_mode<synchronous>, transform_indices = @transform_2, window_bounds = array<i64: 8, 128>}, {pipeline_mode = #tpu.pipeline_mode<synchronous>, transform_indices = @transform_3, window_bounds = array<i64: 1, 128>}, {pipeline_mode = #tpu.pipeline_mode<synchronous>, transform_indices = @transform_4, window_bounds = array<i64: 1, 128>}, {transform_indices = @transform_5, window_bounds = array<i64: 8, 128>}]} {
    %c0_i32 = arith.constant 0 : i32
    %0 = arith.cmpi eq, %arg1, %c0_i32 : i32
    %1 = arith.extui %0 : i1 to i32
    %c0_i32_0 = arith.constant 0 : i32
    %2 = arith.cmpi ne, %1, %c0_i32_0 : i32
    scf.if %2 {
      %cst_13 = arith.constant 0.000000e+00 : f32
      %15 = vector.broadcast %cst_13 : f32 to vector<8x128xf32>
      %c0_14 = arith.constant 0 : index
      %c0_15 = arith.constant 0 : index
      %16 = vector.load %arg7[%c0_14, %c0_15] : memref<8x128xf32, #tpu.memory_space<vmem>>, vector<8x128xf32>
      tpu.vector_store %arg7[%c0_14, %c0_15], %15 {strides = array<i32>} : memref<8x128xf32, #tpu.memory_space<vmem>>, vector<8x128xf32>,
    } else {
    }
    %c0 = arith.constant 0 : index
    %c0_1 = arith.constant 0 : index
    %3 = vector.load %arg3[%c0, %c0_1] : memref<128x8xf32, #tpu.memory_space<vmem>>, vector<128x8xf32>
    %c0_2 = arith.constant 0 : index
    %c0_3 = arith.constant 0 : index
    %4 = vector.load %arg4[%c0_2, %c0_3] : memref<8x128xf32, #tpu.memory_space<vmem>>, vector<8x128xf32>
    %cst = arith.constant dense<0.000000e+00> : vector<128x128xf32>
    %5 = tpu.matmul %3, %4, %cst {dimension_numbers = #tpu.dot_dimension_numbers<[1], [0], [0], [1], [0, 0, 1, 1], [], []>} : vector<128x8xf32>, vector<8x128xf32>, vector<128x128xf32> -> vector<128x128xf32>
    %6 = arith.truncf %5 : vector<128x128xf32> to vector<128x128xbf16>
    %c0_4 = arith.constant 0 : index
    %c0_5 = arith.constant 0 : index
    %7 = vector.load %arg7[%c0_4, %c0_5] : memref<8x128xf32, #tpu.memory_space<vmem>>, vector<8x128xf32>
    %c0_6 = arith.constant 0 : index
    %c0_7 = arith.constant 0 : index
    %8 = vector.load %arg2[%c0_6, %c0_7] : memref<8x128xbf16, #tpu.memory_space<vmem>>, vector<8x128xbf16>
    %cst_8 = arith.constant dense<0.000000e+00> : vector<8x128xf32>
    %9 = tpu.matmul %8, %6, %cst_8 {dimension_numbers = #tpu.dot_dimension_numbers<[1], [0], [0], [1], [0, 0, 1, 1], [], []>} : vector<8x128xbf16>, vector<128x128xbf16>, vector<8x128xf32> -> vector<8x128xf32>
    %10 = arith.addf %7, %9 : vector<8x128xf32>
    %c0_9 = arith.constant 0 : index
    %c0_10 = arith.constant 0 : index
    %11 = vector.load %arg7[%c0_9, %c0_10] : memref<8x128xf32, #tpu.memory_space<vmem>>, vector<8x128xf32>
    tpu.vector_store %arg7[%c0_9, %c0_10], %10 {strides = array<i32>} : memref<8x128xf32, #tpu.memory_space<vmem>>, vector<8x128xf32>,
    %c0_i32_11 = arith.constant 0 : i32
    %12 = arith.cmpi eq, %arg1, %c0_i32_11 : i32
    %13 = arith.extui %12 : i1 to i32
    %c0_i32_12 = arith.constant 0 : i32
    %14 = arith.cmpi ne, %13, %c0_i32_12 : i32
    scf.if %14 {
      %c0_13 = arith.constant 0 : index
      %c0_14 = arith.constant 0 : index
      %15 = vector.load %arg7[%c0_13, %c0_14] : memref<8x128xf32, #tpu.memory_space<vmem>>, vector<8x128xf32>
      %c0_15 = arith.constant 0 : index
      %c0_16 = arith.constant 0 : index
      %16 = vector.load %arg5[%c0_15, %c0_16] : memref<1x128xf32, #tpu.memory_space<vmem>>, vector<1x128xf32>
      %17 = vector.broadcast %16 : vector<1x128xf32> to vector<8x128xf32>
      %18 = arith.addf %15, %17 : vector<8x128xf32>
      %cst_17 = arith.constant 0.000000e+00 : f32
      %19 = vector.broadcast %cst_17 : f32 to vector<8x128xf32>
      %20 = arith.cmpf ogt, %18, %19 : vector<8x128xf32>
      %c0_18 = arith.constant 0 : index
      %c0_19 = arith.constant 0 : index
      %21 = vector.load %arg6[%c0_18, %c0_19] : memref<1x128xf32, #tpu.memory_space<vmem>>, vector<1x128xf32>
      %22 = vector.broadcast %21 : vector<1x128xf32> to vector<8x128xf32>
      %23 = arith.mulf %22, %18 : vector<8x128xf32>
      %24 = arith.select %20, %18, %23 : vector<8x128xi1>, vector<8x128xf32>
      %c0_20 = arith.constant 0 : index
      %c0_21 = arith.constant 0 : index
      %25 = vector.load %arg7[%c0_20, %c0_21] : memref<8x128xf32, #tpu.memory_space<vmem>>, vector<8x128xf32>
      tpu.vector_store %arg7[%c0_20, %c0_21], %24 {strides = array<i32>} : memref<8x128xf32, #tpu.memory_space<vmem>>, vector<8x128xf32>,
    } else {
    }
    return
  }
  func.func @transform_0(%arg0: i32, %arg1: i32) -> (i32, i32) {
    %c0_i32 = arith.constant 0 : i32
    return %arg0, %arg1 : i32, i32
  }
  func.func @transform_1(%arg0: i32, %arg1: i32) -> (i32, i32) {
    %c0_i32 = arith.constant 0 : i32
    %c0_i32_0 = arith.constant 0 : i32
    return %arg1, %c0_i32 : i32, i32
  }
  func.func @transform_2(%arg0: i32, %arg1: i32) -> (i32, i32) {
    %c0_i32 = arith.constant 0 : i32
    %c0_i32_0 = arith.constant 0 : i32
    %c0_i32_1 = arith.constant 0 : i32
    return %c0_i32, %c0_i32_0 : i32, i32
  }
  func.func @transform_3(%arg0: i32, %arg1: i32) -> (i32, i32) {
    %c0_i32 = arith.constant 0 : i32
    %c0_i32_0 = arith.constant 0 : i32
    %c0_i32_1 = arith.constant 0 : i32
    return %c0_i32, %c0_i32_0 : i32, i32
  }
  func.func @transform_4(%arg0: i32, %arg1: i32) -> (i32, i32) {
    %c0_i32 = arith.constant 0 : i32
    %c0_i32_0 = arith.constant 0 : i32
    %c0_i32_1 = arith.constant 0 : i32
    return %c0_i32, %c0_i32_0 : i32, i32
  }
  func.func @transform_5(%arg0: i32, %arg1: i32) -> (i32, i32) {
    %c0_i32 = arith.constant 0 : i32
    %c0_i32_0 = arith.constant 0 : i32
    return %arg0, %c0_i32 : i32, i32
  }
}

</mosaic_0001>

<bundles_post_ra>
// kernel: tpu_custom_call.1
= control target key start
LH: loop header
LB: loop body
LE: loop exit
PB: predicated region body
PF: predicated region fallthrough
CT: control target
= control target key end

     0   :  { %vm44_vm0 = vcmask 64512   ;;  %s565_s0 = inlined_call_operand.vmem [shape: bf16[8,128], index: 0, kind: input, shape index: {}]   ;;  %s566_s1 = inlined_call_operand.vmem [shape: f32[128,8], index: 1, kind: input, shape index: {}]   ;;  %s567_s2 = inlined_call_operand.vmem [shape: f32[8,128], index: 2, kind: input, shape index: {}]   ;;  %s568_s3 = inlined_call_operand.vmem [shape: f32[1,128], index: 3, kind: input, shape index: {}]   ;;  %s569_s4 = inlined_call_operand.vmem [shape: f32[1,128], index: 4, kind: input, shape index: {}]   ;;  %s570_s5 = inlined_call_operand.hbm [shape: f32[8,128], index: 5, kind: output, shape index: {}]  }
   0x1   :  { %v43_v0 = vld [vmem:[%s567_s2] sm:$0xff]  ;;  %v28_v2 = vld [vmem:[%s566_s1 + $0x8] sm:$0xff]  ;;  %v29_v3 = vld [vmem:[%s566_s1 + $0x10] sm:$0xff] }
   0x2   :  { %v27_v1 = vld [vmem:[%s566_s1] sm:$0xff]  ;;  %371 = vmatprep.subr.mxu0 %v43_v0  ;;  %v30_v4 = vld [vmem:[%s566_s1 + $0x18] sm:$0xff] }
   0x3   :  { %373 = vmatprep.mubr.msk.f32.mxu0 %vm44_vm0, %v27_v1  ;;  %372 = vmatpush3.msra.mxu0 %v43_v0  ;;  %v31_v5 = vld [vmem:[%s566_s1 + $0x20] sm:$0xff] }
   0x4   :  { %374 = vmatmul.mubr.msk.f32.vlgmr.msra.gmra.mrb[0].mxu0 %vm44_vm0, %v28_v2 }
   0x5   :  { %376 = vmatprep.mubr.msk.f32.mxu0 %vm44_vm0, %v29_v3 }
   0x6   :  { %10 = vsyncpa [#allocation3], 0  ;;  %v32_v6 = vld [vmem:[%s566_s1 + $0x28] sm:$0xff]  ;;  %v33_v7 = vld [vmem:[%s566_s1 + $0x30] sm:$0xff]  ;;  %v444_v17 = vmov 0.0   ;;  %vm445_vm1 = vmmov 0  }
   0x7   :  { %v34_v8 = vld [vmem:[%s566_s1 + $0x38] sm:$0xff]  ;;  %v35_v9 = vld [vmem:[%s566_s1 + $0x40] sm:$0xff]  ;;  %v36_v10 = vld [vmem:[%s566_s1 + $0x48] sm:$0xff]  ;;  %397 = vmatprep.subr.bf16.mxu1 %v444_v17  ;;  %413 = vmatprep.mubr.msk.bf16.mxu1 %vm445_vm1, %v444_v17  ;;  %s446_s30 = smov [#allocation2]  }
   0x8   :  { %377 = vmatmul.mubr.msk.f32.gmra.mrb[2].mxu0 %vm44_vm0, %v30_v4  ;;  %v37_v11 = vld [vmem:[%s566_s1 + $0x50] sm:$0xff]  ;;  %v38_v12 = vld [vmem:[%s566_s1 + $0x58] sm:$0xff]  ;;  %v39_v13 = vld [vmem:[%s566_s1 + $0x60] sm:$0xff]  ;;  %s319_s6 = sshll.u32 %s446_s30, 4  ;;  %s320_s6 = int_to_ptr.vmem [resolvable:$true] %s319_s6 }
   0x9   :  { %379 = vmatprep.mubr.msk.f32.mxu0 %vm44_vm0, %v31_v5  ;;  %v40_v14 = vld [vmem:[%s566_s1 + $0x68] sm:$0xff]  ;;  %v41_v15 = vld [vmem:[%s566_s1 + $0x70] sm:$0xff]  ;;  %v42_v16 = vld [vmem:[%s566_s1 + $0x78] sm:$0xff]  ;;  %p425_p1 = scmp.lt.s32.totalorder %s320_s6, %s320_s6 }
   0xa   :  { %v247_v42 = vld [vmem:[%s565_s0] sm:$0xf]  ;;  %s420_s0 = scalar_lea.vmem %s320_s6, 128 }
   0xb   :  { %v343_v44 = vld [vmem:[%s568_s3] ss:$0 sm:$0xff]  ;;  %p421_p0 = scmp.ne.s32.totalorder %s320_s6, %s420_s0  ;;  %p426_p2 = scmp.lt.s32.totalorder %s420_s0, %s420_s0 }
   0xc   :  { %380 = vmatmul.mubr.msk.f32.gmra.mrb[4].mxu0 %vm44_vm0, %v32_v6  ;;  %v344_v47 = vld [vmem:[%s569_s4] ss:$0 sm:$0xff] }
   0xd   :  { %382 = vmatprep.mubr.msk.f32.mxu0 %vm44_vm0, %v33_v7  ;;  %p427_p3 = por %p426_p2, %p425_p1 }
   0xf   :  { %p428_p4 = pnand %p427_p3, %p421_p0 }
  0x10   :  { %383 = vmatmul.mubr.msk.f32.gmra.mrb[6].mxu0 %vm44_vm0, %v34_v8 }
  0x11   :  { %385 = vmatprep.mubr.msk.f32.mxu0 %vm44_vm0, %v35_v9 }
  0x14   :  { %386 = vmatmul.mubr.msk.f32.gmra.mrb[8].mxu0 %vm44_vm0, %v36_v10 }
  0x15   :  { %388 = vmatprep.mubr.msk.f32.mxu0 %vm44_vm0, %v37_v11 }
  0x18   :  { %389 = vmatmul.mubr.msk.f32.gmra.mrb[10].mxu0 %vm44_vm0, %v38_v12 }
  0x19   :  { %391 = vmatprep.mubr.msk.f32.mxu0 %vm44_vm0, %v39_v13 }
  0x1c   :  { %392 = vmatmul.mubr.msk.f32.gmra.mrb[12].mxu0 %vm44_vm0, %v40_v14 }
  0x1d   :  { %394 = vmatprep.mubr.msk.f32.mxu0 %vm44_vm0, %v41_v15 }
  0x20   :  { %395 = vmatmul.mubr.msk.f32.gmra.mrb[14].mxu0 %vm44_vm0, %v42_v16 }
  0xd7   :  { %v375_v18 = vpop.f32.mrb[0].mxu0 }
  0xd8   :  { %v159_v19 = vpop.f32.mrb[1].mxu0 }
  0xd9   :  { %v238_v20 = vpack.c.bf16 %v375_v18, %v159_v19 }
  0xdb   :  { %v378_v21 = vpop.f32.mrb[2].mxu0  ;;  %398 = vmatpush3.bf16.msra.mxu1 %v238_v20 }
  0xdc   :  { %v169_v22 = vpop.f32.mrb[3].mxu0  ;;  %399 = vmatprep.subr.bf16.mxu1 %v444_v17 }
  0xdd   :  { %v239_v23 = vpack.c.bf16 %v378_v21, %v169_v22 }
  0xdf   :  { %v381_v24 = vpop.f32.mrb[4].mxu0  ;;  %400 = vmatpush3.bf16.msra.mxu1 %v239_v23 }
  0xe0   :  { %v179_v25 = vpop.f32.mrb[5].mxu0  ;;  %401 = vmatprep.subr.bf16.mxu1 %v444_v17 }
  0xe1   :  { %v240_v26 = vpack.c.bf16 %v381_v24, %v179_v25 }
  0xe3   :  { %v384_v27 = vpop.f32.mrb[6].mxu0  ;;  %402 = vmatpush3.bf16.msra.mxu1 %v240_v26 }
  0xe4   :  { %v189_v28 = vpop.f32.mrb[7].mxu0  ;;  %403 = vmatprep.subr.bf16.mxu1 %v444_v17 }
  0xe5   :  { %v241_v29 = vpack.c.bf16 %v384_v27, %v189_v28 }
  0xe7   :  { %v387_v30 = vpop.f32.mrb[8].mxu0  ;;  %404 = vmatpush3.bf16.msra.mxu1 %v241_v29 }
  0xe8   :  { %v199_v31 = vpop.f32.mrb[9].mxu0  ;;  %405 = vmatprep.subr.bf16.mxu1 %v444_v17 }
  0xe9   :  { %v242_v32 = vpack.c.bf16 %v387_v30, %v199_v31 }
  0xeb   :  { %v390_v33 = vpop.f32.mrb[10].mxu0  ;;  %406 = vmatpush3.bf16.msra.mxu1 %v242_v32 }
  0xec   :  { %v209_v34 = vpop.f32.mrb[11].mxu0  ;;  %407 = vmatprep.subr.bf16.mxu1 %v444_v17 }
  0xed   :  { %v243_v35 = vpack.c.bf16 %v390_v33, %v209_v34 }
  0xef   :  { %v393_v36 = vpop.f32.mrb[12].mxu0  ;;  %408 = vmatpush3.bf16.msra.mxu1 %v243_v35 }
  0xf0   :  { %v219_v37 = vpop.f32.mrb[13].mxu0  ;;  %409 = vmatprep.subr.bf16.mxu1 %v444_v17 }
  0xf1   :  { %v244_v38 = vpack.c.bf16 %v393_v36, %v219_v37 }
  0xf3   :  { %v396_v39 = vpop.f32.mrb[14].mxu0  ;;  %410 = vmatpush3.bf16.msra.mxu1 %v244_v38 }
  0xf4   :  { %v229_v40 = vpop.f32.mrb[15].mxu0  ;;  %411 = vmatprep.subr.bf16.mxu1 %v444_v17 }
  0xf5   :  { %v245_v41 = vpack.c.bf16 %v396_v39, %v229_v40 }
  0xf7   :  { %412 = vmatpush3.bf16.msra.mxu1 %v245_v41 }
  0xfa   :  { %414 = vmatmul.mubr.bf16.vlgmr.msra.gmra.mrb[0].mxu1 %v247_v42 }
 0x1cd   :  { %v282_v43 = vpop.f32.mrb[0].mxu1 }
 0x1ce   :  { %v415_v45 = vpop.f32.mrb[1].mxu1  ;;  %v301_v49 = vadd.f32 %v343_v44, %v282_v43 }
 0x1cf   :  { %v285_v46 = vpop.f32.mrb[2].mxu1 }
 0x1d0   :  { %v416_v48 = vpop.f32.mrb[3].mxu1  ;;  %vm302_vm2 = vcmp.gt.f32.partialorder %v301_v49, 0.0  ;;  %v310_v50 = vmul.f32 %v344_v47, %v301_v49 }
 0x1d2   :  { %v311_v51 = vsel %vm302_vm2, %v301_v49, %v310_v50 }
 0x1d3   :  { %312 = vst [vmem:[#allocation2] sm:$0xff] %v311_v51 }
 0x1d4   :  { %431 = shalt.err (!%p428_p4)
}
 0x1d5   :  { %s432_s4 = scalar_lea.hbm %s570_s5, 128 }
 0x1d6   :  { %p433_p5 = scmp.ne.s32.totalorder %s570_s5, %s432_s4  ;;  %p436_p6 = scmp.lt.u32.totalorder %s432_s4, %s570_s5 }
 0x1d8   :  { %p438_p7 = pnand %p436_p6, %p433_p5 }
 0x1da   :  { %441 = shalt.err (!%p438_p7)
}
 0x1db   :  { %322 = dma.vmem_to_hbm [thread:$0]  %s320_s6, 128, %s570_s5, [#allocation3]  }
 0x1dc   :  { %442 = dma.done.wait [#allocation3], 128  }
 0x1dd   :  { %443 = vsyncadd [#allocation3], 4294967168 }
 0x1de   :  { %326 = vsyncpa [#allocation3], 1 }

</bundles_post_ra>
